<compile_context>
chip_gen: v6e
topology: v6e:2x2x1
jax: 0.10.0
libtpu: 0.0.40
codegen_flags: <defaults>
</compile_context>

<pallas_src>
import jax
import jax.numpy as jnp
from jax.experimental import pallas as pl
from jax.experimental.pallas import tpu as pltpu

NUM_ACTIONS = 4
NUM_STATES = 54

H1 = 256
H2 = 128
HEAD_OUT = NUM_ACTIONS + 1   # 4 policy logits + 1 value
HEAD_W = 8                   # fused head output width (narrow store; 5 useful lanes)


def _round_up(n, m):
    return ((n + m - 1) // m) * m


def policy_net_kernel(x_ref, w1_ref, b1_ref, w2_ref, b2_ref, wh_ref, bh_ref, out_ref):
    # bf16 operands, f32 accumulation on the MXU.
    x = x_ref[...].astype(jnp.bfloat16)
    # fc1 + ReLU
    h1 = jnp.dot(x, w1_ref[...], preferred_element_type=jnp.float32) + b1_ref[...]
    h1 = jnp.maximum(h1, 0.0).astype(jnp.bfloat16)
    # fc2 + ReLU
    h2 = jnp.dot(h1, w2_ref[...], preferred_element_type=jnp.float32) + b2_ref[...]
    h2 = jnp.maximum(h2, 0.0).astype(jnp.bfloat16)
    # fused (policy || value || pad) head -> single narrow (tile_b, 8) f32 store
    out_ref[...] = (jnp.dot(h2, wh_ref[...], preferred_element_type=jnp.float32)
                    + bh_ref[...])


def prepare_params(params):
    """Fuse/convert torch-layout f32 params into kernel-ready (bf16 weight) layout."""
    w1, b1, w2, b2, wp, bp, wv, bv = params
    # fused head: columns [0:4] = policy, [4:5] = value, [5:8] = zeros
    wh = jnp.zeros((H2, HEAD_W), jnp.float32)
    wh = wh.at[:, :NUM_ACTIONS].set(wp)
    wh = wh.at[:, NUM_ACTIONS:HEAD_OUT].set(wv)
    bh = jnp.zeros((1, HEAD_W), jnp.float32)
    bh = bh.at[:, :NUM_ACTIONS].set(bp)
    bh = bh.at[:, NUM_ACTIONS:HEAD_OUT].set(bv)
    # Weights in bf16 (MXU-native); biases stay f32 (added post-accumulation).
    return (w1.astype(jnp.bfloat16), b1,
            w2.astype(jnp.bfloat16), b2,
            wh.astype(jnp.bfloat16), bh)


def policy_net_forward(x, prepared_params, tile_b=4096):
    """x: (B, 54) f32.  Returns (logits (B, 4), value (B, 1))."""
    B = x.shape[0]
    w1, b1, w2, b2, wh, bh = prepared_params

    # Tile sizing: multiple of 8 sublanes; big enough to amortize per-step
    # overhead; small enough that moderate batches still give >= 2 grid steps
    # (so v7x's two TensorCores both get work under "parallel" semantics).
    tile_b = _round_up(max(8, tile_b), 8)
    two_core_tile = max(8, _round_up(pl.cdiv(B, 2), 8))
    tile_b = min(tile_b, two_core_tile)
    grid = (pl.cdiv(B, tile_b),)

    weight_bytes = (NUM_STATES * H1 + H1 * H2 + H2 * HEAD_W) * 2 + (H1 + H2 + HEAD_W) * 4
    cost = pl.CostEstimate(
        flops=2 * B * (NUM_STATES * H1 + H1 * H2 + H2 * HEAD_W),
        transcendentals=0,
        bytes_accessed=B * (NUM_STATES * 4 + HEAD_W * 4) + weight_bytes,
    )

    out = pl.pallas_call(
        policy_net_kernel,
        out_shape=jax.ShapeDtypeStruct((B, HEAD_W), jnp.float32),
        grid=grid,
        in_specs=[
            pl.BlockSpec((tile_b, NUM_STATES), lambda i: (i, 0)),   # x tile (unpadded K=54)
            pl.BlockSpec((NUM_STATES, H1), lambda i: (0, 0)),       # w1 (VMEM resident)
            pl.BlockSpec((1, H1), lambda i: (0, 0)),                # b1
            pl.BlockSpec((H1, H2), lambda i: (0, 0)),               # w2
            pl.BlockSpec((1, H2), lambda i: (0, 0)),                # b2
            pl.BlockSpec((H2, HEAD_W), lambda i: (0, 0)),           # fused head W
            pl.BlockSpec((1, HEAD_W), lambda i: (0, 0)),            # fused head b
        ],
        out_specs=pl.BlockSpec((tile_b, HEAD_W), lambda i: (i, 0)),
        compiler_params=pltpu.CompilerParams(
            dimension_semantics=("parallel",),
            vmem_limit_bytes=32 * 1024 * 1024,   # raises v5e's 16 MiB default; no-op elsewhere
        ),
        cost_estimate=cost,
    )(x, w1, b1, w2, b2, wh, bh)

    head = out[:, :HEAD_OUT]                 # single slice of the narrow output
    logits = head[:, :NUM_ACTIONS]
    value = head[:, NUM_ACTIONS:]
    return logits, value


def init_params(key):
    # Deterministic init mimicking torch.nn.Linear default U[-1/sqrt(fan_in), 1/sqrt(fan_in)].
    def linear(key, fan_in, fan_out):
        kw, kb = jax.random.split(key)
        bound = 1.0 / jnp.sqrt(jnp.float32(fan_in))
        w = jax.random.uniform(kw, (fan_in, fan_out), jnp.float32, -bound, bound)
        b = jax.random.uniform(kb, (1, fan_out), jnp.float32, -bound, bound)
        return w, b

    k1, k2, k3, k4 = jax.random.split(key, 4)
    w1, b1 = linear(k1, NUM_STATES, H1)
    w2, b2 = linear(k2, H1, H2)
    wp, bp = linear(k3, H2, NUM_ACTIONS)
    wv, bv = linear(k4, H2, 1)
    return (w1, b1, w2, b2, wp, bp, wv, bv)


def reference_forward(x, params):
    w1, b1, w2, b2, wp, bp, wv, bv = params
    h1 = jnp.maximum(x @ w1 + b1, 0.0)
    h2 = jnp.maximum(h1 @ w2 + b2, 0.0)
    return h2 @ wp + bp, h2 @ wv + bv


if __name__ == "__main__":
    key = jax.random.PRNGKey(0)
    kx, kp, kx2 = jax.random.split(key, 3)
    params = init_params(kp)
    prepared = prepare_params(params)

    # Tolerances are loosened vs. the f32 version: matmul operands are bf16
    # (f32 accumulation), so expect ~1% relative error.
    ATOL = 3e-2
    RTOL = 3e-2

    # Small primary test (B=8): single grid step.
    B = 8
    x = jax.random.normal(kx, (B, NUM_STATES), jnp.float32)
    logits, value = jax.block_until_ready(policy_net_forward(x, prepared))
    ref_logits, ref_value = reference_forward(x, params)
    assert logits.shape == (B, NUM_ACTIONS) and value.shape == (B, 1)
    assert jnp.allclose(logits, ref_logits, atol=ATOL, rtol=RTOL)
    assert jnp.allclose(value, ref_value, atol=ATOL, rtol=RTOL)

    # Secondary test exercising the batch grid + ragged last tile (B=40, tile=16 -> 3 steps,
    # last step partially out of bounds).
    B2 = 40
    x2 = jax.random.normal(kx2, (B2, NUM_STATES), jnp.float32)
    logits2, value2 = jax.block_until_ready(policy_net_forward(x2, prepared, tile_b=16))
    ref_logits2, ref_value2 = reference_forward(x2, params)
    assert logits2.shape == (B2, NUM_ACTIONS) and value2.shape == (B2, 1)
    assert jnp.allclose(logits2, ref_logits2, atol=ATOL, rtol=RTOL)
    assert jnp.allclose(value2, ref_value2, atol=ATOL, rtol=RTOL)

    print("KERNEL_OK")
</pallas_src>

<mosaic_0001>
module attributes {stable_mosaic.version = 11 : i64} {
  func.func @policy_net_kernel(%arg0: i32, %arg1: memref<8x54xf32, #tpu.memory_space<vmem>>, %arg2: memref<54x256xbf16, #tpu.memory_space<vmem>>, %arg3: memref<1x256xf32, #tpu.memory_space<vmem>>, %arg4: memref<256x128xbf16, #tpu.memory_space<vmem>>, %arg5: memref<1x128xf32, #tpu.memory_space<vmem>>, %arg6: memref<128x8xbf16, #tpu.memory_space<vmem>>, %arg7: memref<1x8xf32, #tpu.memory_space<vmem>>, %arg8: memref<8x8xf32, #tpu.memory_space<vmem>>) attributes {dimension_semantics = [#tpu.dimension_semantics<parallel>], iteration_bounds = array<i64: 1>, scalar_prefetch = 0 : i64, scratch_operands = 0 : i64, tpu.core_type = #tpu.core_type<tc>, window_params = [{transform_indices = @transform_0, window_bounds = array<i64: 8, 54>}, {pipeline_mode = #tpu.pipeline_mode<synchronous>, transform_indices = @transform_1, window_bounds = array<i64: 54, 256>}, {pipeline_mode = #tpu.pipeline_mode<synchronous>, transform_indices = @transform_2, window_bounds = array<i64: 1, 256>}, {pipeline_mode = #tpu.pipeline_mode<synchronous>, transform_indices = @transform_3, window_bounds = array<i64: 256, 128>}, {pipeline_mode = #tpu.pipeline_mode<synchronous>, transform_indices = @transform_4, window_bounds = array<i64: 1, 128>}, {pipeline_mode = #tpu.pipeline_mode<synchronous>, transform_indices = @transform_5, window_bounds = array<i64: 128, 8>}, {pipeline_mode = #tpu.pipeline_mode<synchronous>, transform_indices = @transform_6, window_bounds = array<i64: 1, 8>}, {transform_indices = @transform_7, window_bounds = array<i64: 8, 8>}]} {
    %c0 = arith.constant 0 : index
    %c0_0 = arith.constant 0 : index
    %0 = vector.load %arg1[%c0, %c0_0] : memref<8x54xf32, #tpu.memory_space<vmem>>, vector<8x54xf32>
    %1 = arith.truncf %0 : vector<8x54xf32> to vector<8x54xbf16>
    %c0_1 = arith.constant 0 : index
    %c0_2 = arith.constant 0 : index
    %2 = vector.load %arg2[%c0_1, %c0_2] : memref<54x256xbf16, #tpu.memory_space<vmem>>, vector<54x256xbf16>
    %cst = arith.constant dense<0.000000e+00> : vector<8x256xf32>
    %3 = tpu.matmul %1, %2, %cst {dimension_numbers = #tpu.dot_dimension_numbers<[1], [0], [0], [1], [0, 0, 1, 1], [], []>} : vector<8x54xbf16>, vector<54x256xbf16>, vector<8x256xf32> -> vector<8x256xf32>
    %c0_3 = arith.constant 0 : index
    %c0_4 = arith.constant 0 : index
    %4 = vector.load %arg3[%c0_3, %c0_4] : memref<1x256xf32, #tpu.memory_space<vmem>>, vector<1x256xf32>
    %5 = vector.broadcast %4 : vector<1x256xf32> to vector<8x256xf32>
    %6 = arith.addf %3, %5 : vector<8x256xf32>
    %cst_5 = arith.constant 0.000000e+00 : f32
    %7 = vector.broadcast %cst_5 : f32 to vector<8x256xf32>
    %8 = arith.maximumf %6, %7 : vector<8x256xf32>
    %9 = arith.truncf %8 : vector<8x256xf32> to vector<8x256xbf16>
    %c0_6 = arith.constant 0 : index
    %c0_7 = arith.constant 0 : index
    %10 = vector.load %arg4[%c0_6, %c0_7] : memref<256x128xbf16, #tpu.memory_space<vmem>>, vector<256x128xbf16>
    %cst_8 = arith.constant dense<0.000000e+00> : vector<8x128xf32>
    %11 = tpu.matmul %9, %10, %cst_8 {dimension_numbers = #tpu.dot_dimension_numbers<[1], [0], [0], [1], [0, 0, 1, 1], [], []>} : vector<8x256xbf16>, vector<256x128xbf16>, vector<8x128xf32> -> vector<8x128xf32>
    %c0_9 = arith.constant 0 : index
    %c0_10 = arith.constant 0 : index
    %12 = vector.load %arg5[%c0_9, %c0_10] : memref<1x128xf32, #tpu.memory_space<vmem>>, vector<1x128xf32>
    %13 = vector.broadcast %12 : vector<1x128xf32> to vector<8x128xf32>
    %14 = arith.addf %11, %13 : vector<8x128xf32>
    %cst_11 = arith.constant 0.000000e+00 : f32
    %15 = vector.broadcast %cst_11 : f32 to vector<8x128xf32>
    %16 = arith.maximumf %14, %15 : vector<8x128xf32>
    %17 = arith.truncf %16 : vector<8x128xf32> to vector<8x128xbf16>
    %c0_12 = arith.constant 0 : index
    %c0_13 = arith.constant 0 : index
    %18 = vector.load %arg6[%c0_12, %c0_13] : memref<128x8xbf16, #tpu.memory_space<vmem>>, vector<128x8xbf16>
    %cst_14 = arith.constant dense<0.000000e+00> : vector<8x8xf32>
    %19 = tpu.matmul %17, %18, %cst_14 {dimension_numbers = #tpu.dot_dimension_numbers<[1], [0], [0], [1], [0, 0, 1, 1], [], []>} : vector<8x128xbf16>, vector<128x8xbf16>, vector<8x8xf32> -> vector<8x8xf32>
    %c0_15 = arith.constant 0 : index
    %c0_16 = arith.constant 0 : index
    %20 = vector.load %arg7[%c0_15, %c0_16] : memref<1x8xf32, #tpu.memory_space<vmem>>, vector<1x8xf32>
    %21 = vector.broadcast %20 : vector<1x8xf32> to vector<8x8xf32>
    %22 = arith.addf %19, %21 : vector<8x8xf32>
    %c0_17 = arith.constant 0 : index
    %c0_18 = arith.constant 0 : index
    %23 = vector.load %arg8[%c0_17, %c0_18] : memref<8x8xf32, #tpu.memory_space<vmem>>, vector<8x8xf32>
    tpu.vector_store %arg8[%c0_17, %c0_18], %22 {strides = array<i32>} : memref<8x8xf32, #tpu.memory_space<vmem>>, vector<8x8xf32>,
    return
  }
  func.func @transform_0(%arg0: i32) -> (i32, i32) {
    %c0_i32 = arith.constant 0 : i32
    %c0_i32_0 = arith.constant 0 : i32
    return %arg0, %c0_i32 : i32, i32
  }
  func.func @transform_1(%arg0: i32) -> (i32, i32) {
    %c0_i32 = arith.constant 0 : i32
    %c0_i32_0 = arith.constant 0 : i32
    %c0_i32_1 = arith.constant 0 : i32
    return %c0_i32, %c0_i32_0 : i32, i32
  }
  func.func @transform_2(%arg0: i32) -> (i32, i32) {
    %c0_i32 = arith.constant 0 : i32
    %c0_i32_0 = arith.constant 0 : i32
    %c0_i32_1 = arith.constant 0 : i32
    return %c0_i32, %c0_i32_0 : i32, i32
  }
  func.func @transform_3(%arg0: i32) -> (i32, i32) {
    %c0_i32 = arith.constant 0 : i32
    %c0_i32_0 = arith.constant 0 : i32
    %c0_i32_1 = arith.constant 0 : i32
    return %c0_i32, %c0_i32_0 : i32, i32
  }
  func.func @transform_4(%arg0: i32) -> (i32, i32) {
    %c0_i32 = arith.constant 0 : i32
    %c0_i32_0 = arith.constant 0 : i32
    %c0_i32_1 = arith.constant 0 : i32
    return %c0_i32, %c0_i32_0 : i32, i32
  }
  func.func @transform_5(%arg0: i32) -> (i32, i32) {
    %c0_i32 = arith.constant 0 : i32
    %c0_i32_0 = arith.constant 0 : i32
    %c0_i32_1 = arith.constant 0 : i32
    return %c0_i32, %c0_i32_0 : i32, i32
  }
  func.func @transform_6(%arg0: i32) -> (i32, i32) {
    %c0_i32 = arith.constant 0 : i32
    %c0_i32_0 = arith.constant 0 : i32
    %c0_i32_1 = arith.constant 0 : i32
    return %c0_i32, %c0_i32_0 : i32, i32
  }
  func.func @transform_7(%arg0: i32) -> (i32, i32) {
    %c0_i32 = arith.constant 0 : i32
    %c0_i32_0 = arith.constant 0 : i32
    return %arg0, %c0_i32 : i32, i32
  }
}

</mosaic_0001>

<bundles_post_ra>
// kernel: tpu_custom_call.1
= control target key start
LH: loop header
LB: loop body
LE: loop exit
PB: predicated region body
PF: predicated region fallthrough
CT: control target
= control target key end

     0   :  { %12 = vsyncpa [#allocation3], 0  ;;  %s742_s0 = inlined_call_operand.vmem [shape: f32[8,54], index: 0, kind: input, shape index: {}]   ;;  %s743_s1 = inlined_call_operand.vmem [shape: bf16[54,256], index: 1, kind: input, shape index: {}]   ;;  %s744_s2 = inlined_call_operand.vmem [shape: f32[1,256], index: 2, kind: input, shape index: {}]   ;;  %s745_s3 = inlined_call_operand.hbm [shape: bf16[256,128], index: 3, kind: input, shape index: {}]   ;;  %s746_s4 = inlined_call_operand.vmem [shape: f32[1,128], index: 4, kind: input, shape index: {}]   ;;  %s747_s5 = inlined_call_operand.vmem [shape: bf16[128,8], index: 5, kind: input, shape index: {}]   ;;  %s748_s6 = inlined_call_operand.vmem [shape: f32[1,8], index: 6, kind: input, shape index: {}]   ;;  %s749_s7 = inlined_call_operand.hbm [shape: f32[8,8], index: 7, kind: output, shape index: {}]  }
   0x1   :  { %13 = vsyncpa [#allocation4], 0  ;;  %s632_s24 = smov [#allocation2]  }
   0x2   :  { %s25_s25 = sshll.u32 %s632_s24, 4  ;;  %s26_s25 = int_to_ptr.vmem [resolvable:$true] %s25_s25 }
   0x3   :  { %s596_s26 = scalar_lea.vmem %s26_s25, 2048  ;;  %p601_p1 = scmp.lt.s32.totalorder %s26_s25, %s26_s25 }
   0x4   :  { %p597_p0 = scmp.ne.s32.totalorder %s26_s25, %s596_s26  ;;  %p602_p2 = scmp.lt.s32.totalorder %s596_s26, %s596_s26 }
   0x6   :  { %p603_p3 = por %p602_p2, %p601_p1 }
   0x8   :  { %p604_p4 = pnand %p603_p3, %p597_p0 }
   0xa   :  { %607 = shalt.err (!%p604_p4)
}
   0xb   :  { %s633_s27 = smov 64   ;;  %s634_s28 = smov 4  }
   0xc   :  { %31 = dma.hbm_to_vmem [thread:$0]  %s745_s3, 2048, %s26_s25, [#allocation3], %s633_s27, %s633_s27, %s634_s28  }
   0xd   :  { %628 = dma.done.wait [#allocation3], 2048  }
   0xe   :  { %629 = vsyncadd [#allocation3], 4294965248  ;;  %v635_v0 = vmov 0   ;;  %v50_v1 = vld [vmem:[%s743_s1 + $0x30] sm:$0x77]  ;;  %vm102_vm0 = vcmask 1042432   ;;  %v53_v35 = vlaneseq }
   0xf   :  { %141 = vmatprep.mubr.bf16.mxu0 %v635_v0  ;;  %v466_v2 = vcombine.high %v50_v1, %v50_v1  ;;  %v465_v3 = vcombine.low %v50_v1, %v50_v1  ;;  %v555_v4 = vld [vmem:[%s743_s1 + $0x24] ss:$8 sps:$4 sm:$0xff]   ;;  %v557_v6 = vld [vmem:[%s743_s1 + $0x20] ss:$8 sps:$4 sm:$0xff]   ;;  %v558_v7 = vld [vmem:[%s743_s1 + $0x14] ss:$8 sps:$4 sm:$0xff]  }
  0x10   :  { %v564_v8 = vld [vmem:[#allocation2 + $0x78] sm:$0xff]   ;;  %v561_v11 = vld [vmem:[%s743_s1 + $0x4] ss:$8 sps:$4 sm:$0xff]   ;;  %v566_v12 = vld [vmem:[#allocation2 + $0x70] sm:$0xff]   ;;  %vm98_vm1 = vcmask 441344   ;;  %v636_v30 = vmov 0.0  }
  0x11   :  { %467 = vmatprep.subr.msk.bf16.mxu0 %vm102_vm0, %v466_v2  ;;  %v104_v5 = vsel %vm102_vm0, %v465_v3, 0  ;;  %v560_v9 = vld [vmem:[%s743_s1 + $0x10] ss:$8 sps:$4 sm:$0xff]   ;;  %495 = vmatprep.subr.bf16.mxu1 %v564_v8  ;;  %v568_v14 = vld [vmem:[#allocation2 + $0x68] sm:$0xff]   ;;  %v42_v16 = vld [vmem:[%s742_s0] sm:$0xff]  ;;  %v54_v36 = vshrl.u32 %v53_v35, 7 }
  0x12   :  { %118 = vmatpush1.bf16.msra.mxu0 %v104_v5  ;;  %v565_v10 = vld [vmem:[#allocation2 + $0x38] sm:$0xff]   ;;  %v567_v13 = vld [vmem:[#allocation2 + $0x30] sm:$0xff]   ;;  %v563_v15 = vld [vmem:[%s743_s1] ss:$8 sps:$4 sm:$0xff]   ;;  %v43_v19 = vpack.c.bf16 %v42_v16, %v42_v16  ;;  %vm637_vm2 = vmmov 0   ;;  %vm442_vm3 = vcmask 64512  }
  0x13   :  { %119 = vmatprep.subr.bf16.mxu0 %v555_v4  ;;  %496 = vmatpush3.bf16.msra.mxu1 %v565_v10  ;;  %v569_v17 = vld [vmem:[#allocation2 + $0x28] sm:$0xff]   ;;  %v570_v18 = vld [vmem:[#allocation2 + $0x60] sm:$0xff]   ;;  %v572_v21 = vld [vmem:[#allocation2 + $0x58] sm:$0xff]   ;;  %v55_v37 = vsub.s32 0, %v54_v36  ;;  %v59_v39 = vsub.s32 1, %v54_v36 }
  0x14   :  { %497 = vmatprep.subr.bf16.mxu1 %v566_v12  ;;  %v571_v20 = vld [vmem:[#allocation2 + $0x20] sm:$0xff]   ;;  %v573_v22 = vld [vmem:[#allocation2 + $0x18] sm:$0xff]   ;;  %v574_v23 = vld [vmem:[#allocation2 + $0x50] sm:$0xff]  }
  0x15   :  { %v575_v24 = vld [vmem:[#allocation2 + $0x10] sm:$0xff]   ;;  %v576_v25 = vld [vmem:[#allocation2 + $0x48] sm:$0xff]   ;;  %v578_v27 = vld [vmem:[#allocation2 + $0x40] sm:$0xff]  }
  0x16   :  { %120 = vmatpush1.bf16.msra.mxu0 %v557_v6  ;;  %v577_v26 = vld [vmem:[#allocation2 + $0x8] sm:$0xff]   ;;  %v579_v28 = vld [vmem:[#allocation2] sm:$0xff]   ;;  %v580_v29 = vld [vmem:[%s747_s5 + $0x38] sm:$0xff]  }
  0x17   :  { %121 = vmatprep.subr.bf16.mxu0 %v558_v7  ;;  %498 = vmatpush3.bf16.msra.mxu1 %v567_v13  ;;  %v581_v31 = vld [vmem:[%s747_s5 + $0x30] sm:$0xff]   ;;  %v582_v32 = vld [vmem:[%s747_s5 + $0x28] sm:$0xff]   ;;  %v583_v33 = vld [vmem:[%s747_s5 + $0x20] sm:$0xff]  }
  0x18   :  { %499 = vmatprep.subr.bf16.mxu1 %v568_v14  ;;  %v584_v34 = vld [vmem:[%s747_s5 + $0x18] sm:$0xff]   ;;  %v51_v38 = vld [vmem:[%s744_s2] sm:$0x3]  ;;  %v585_v52 = vld [vmem:[%s747_s5 + $0x10] sm:$0xff]  }
  0x19   :  { %v56_v40 = vrot.slane %v51_v38, %v55_v37  ;;  %v60_v41 = vrot.slane %v51_v38, %v59_v39  ;;  %v586_v53 = vld [vmem:[%s747_s5 + $0x8] sm:$0xff]   ;;  %v587_v54 = vld [vmem:[%s747_s5] sm:$0xff]   ;;  %s638_s5 = smov [#allocation5]  }
  0x1a   :  { %122 = vmatpush1.bf16.msra.mxu0 %v560_v9  ;;  %v469_v56 = vld [vmem:[%s746_s4] ss:$0 sm:$0xff]  ;;  %s450_s18 = sshll.u32 %s638_s5, 4  ;;  %s451_s18 = int_to_ptr.vmem [resolvable:$true] %s450_s18 }
  0x1b   :  { %123 = vmatprep.subr.bf16.mxu0 %v561_v11  ;;  %500 = vmatpush3.bf16.msra.mxu1 %v569_v17  ;;  %v486_v0 = vld [vmem:[%s748_s6] ss:$0 sm:$0xff]  ;;  %s608_s4 = scalar_lea.vmem %s451_s18, 128  ;;  %p613_p6 = scmp.lt.s32.totalorder %s451_s18, %s451_s18 }
  0x1c   :  { %501 = vmatprep.subr.bf16.mxu1 %v570_v18  ;;  %p609_p5 = scmp.ne.s32.totalorder %s451_s18, %s608_s4  ;;  %p614_p7 = scmp.lt.s32.totalorder %s608_s4, %s608_s4 }
  0x1e   :  { %124 = vmatpush1.bf16.msra.mxu0 %v563_v15  ;;  %p615_p8 = por %p614_p7, %p613_p6 }
  0x1f   :  { %502 = vmatpush3.bf16.msra.mxu1 %v571_v20  ;;  %526 = vmatprep.subr.bf16.mxu0 %v636_v30 }
  0x20   :  { %503 = vmatprep.subr.bf16.mxu1 %v572_v21  ;;  %p616_p9 = pnand %p615_p8, %p609_p5 }
  0x21   :  { %468 = vmatmul.mubr.msk.bf16.vlgmr.msra.gmra.mxu0 %vm98_vm1, %v43_v19 }
  0x22   :  { %527 = vmatpush3.bf16.msra.mxu0 %v580_v29  ;;  %542 = vmatprep.mubr.msk.bf16.mxu0 %vm637_vm2, %v636_v30 }
  0x23   :  { %504 = vmatpush3.bf16.msra.mxu1 %v573_v22  ;;  %528 = vmatprep.subr.bf16.mxu0 %v636_v30 }
  0x24   :  { %505 = vmatprep.subr.bf16.mxu1 %v574_v23 }
  0x26   :  { %529 = vmatpush3.bf16.msra.mxu0 %v581_v31 }
  0x27   :  { %506 = vmatpush3.bf16.msra.mxu1 %v575_v24  ;;  %530 = vmatprep.subr.bf16.mxu0 %v636_v30 }
  0x28   :  { %507 = vmatprep.subr.bf16.mxu1 %v576_v25 }
  0x2a   :  { %531 = vmatpush3.bf16.msra.mxu0 %v582_v32 }
  0x2b   :  { %508 = vmatpush3.bf16.msra.mxu1 %v577_v26  ;;  %532 = vmatprep.subr.bf16.mxu0 %v636_v30 }
  0x2c   :  { %509 = vmatprep.subr.bf16.mxu1 %v578_v27 }
  0x2e   :  { %533 = vmatpush3.bf16.msra.mxu0 %v583_v33 }
  0x2f   :  { %510 = vmatpush3.bf16.msra.mxu1 %v579_v28  ;;  %534 = vmatprep.subr.bf16.mxu0 %v636_v30 }
  0x32   :  { %535 = vmatpush3.bf16.msra.mxu0 %v584_v34 }
  0x33   :  { %536 = vmatprep.subr.bf16.mxu0 %v636_v30 }
  0x36   :  { %537 = vmatpush3.bf16.msra.mxu0 %v585_v52 }
  0x37   :  { %538 = vmatprep.subr.bf16.mxu0 %v636_v30 }
  0x3a   :  { %539 = vmatpush3.bf16.msra.mxu0 %v586_v53 }
  0x3b   :  { %540 = vmatprep.subr.bf16.mxu0 %v636_v30 }
  0x3e   :  { %541 = vmatpush3.bf16.msra.mxu0 %v587_v54 }
  0xe1   :  { %v143_v42 = vpop.f32.mrf.mxu0 }
  0xe2   :  { %v144_v43 = vadd.f32 %v143_v42, %v56_v40 }
  0xe3   :  { %v145_v44 = vpop.f32.mrf.mxu0 }
  0xe4   :  { %v146_v45 = vadd.f32 %v145_v44, %v60_v41  ;;  %v150_v46 = vmax.f32 %v144_v43, 0.0 }
  0xe5   :  { %v147_v47 = vpop.f32.mrf.mxu0 }
  0xe6   :  { %v151_v48 = vmax.f32 %v146_v45, 0.0  ;;  %v152_v51 = vpack.c.bf16 %v150_v46, %v150_v46 }
  0xe7   :  { %v148_v49 = vpop.f32.mrf.mxu0 }
  0xe8   :  { %v153_v50 = vpack.c.bf16 %v151_v48, %v151_v48 }
  0xea   :  { %321 = vmatprep.mubr.bf16.mxu1 %v153_v50 }
  0xeb   :  { %322 = vmatmul.mubr.bf16.vlgmr.msra.gmra.mxu1 %v152_v51 }
 0x1ab   :  { %v511_v55 = vpop.f32.mrf.mxu1 }
 0x1ad   :  { %v512_v57 = vpop.f32.mrf.mxu1 }
 0x1ae   :  { %v513_v58 = vadd.f32 %v512_v57, %v511_v55 }
 0x1af   :  { %v514_v59 = vpop.f32.mrf.mxu1 }
 0x1b0   :  { %v324_v60 = vadd.f32 %v513_v58, %v469_v56 }
 0x1b1   :  { %v515_v61 = vpop.f32.mrf.mxu1 }
 0x1b2   :  { %v329_v62 = vmax.f32 %v324_v60, 0.0 }
 0x1b4   :  { %v330_v63 = vpack.c.bf16 %v329_v62, %v329_v62 }
 0x1b6   :  { %543 = vmatmul.mubr.bf16.vlgmr.msra.gmra.mxu0 %v330_v63 }
 0x276   :  { %v436_v1 = vpop.f32.mrf.mxu0 }
 0x277   :  { %v437_v2 = vadd.f32 %v486_v0, %v436_v1 }
 0x278   :  { %v544_v3 = vpop.f32.mrf.mxu0 }
 0x279   :  { %443 = vst.msk [vmem:[#allocation5] sm:$0xff] %vm442_vm3, %v437_v2 }
 0x27a   :  { %v439_v4 = vpop.f32.mrf.mxu0 }
 0x27b   :  { %619 = shalt.err (!%p616_p9)
}
 0x27c   :  { %453 = dma.vmem_to_hbm [thread:$0]  %s451_s18, 128, %s749_s7, [#allocation4]   ;;  %v545_v5 = vpop.f32.mrf.mxu0 }
 0x27d   :  { %630 = dma.done.wait [#allocation4], 128  }
 0x27e   :  { %631 = vsyncadd [#allocation4], 4294967168 }
 0x27f   :  { %457 = vsyncpa [#allocation3], 1 }
 0x280   :  { %458 = vsyncpa [#allocation4], 1 }

</bundles_post_ra>
